<compile_context>
chip_gen: v6e
topology: v6e:2x2x1
jax: 0.10.0
libtpu: 0.0.40
codegen_flags: <defaults>
</compile_context>

<pallas_src>
import functools

import jax
import jax.numpy as jnp
import numpy as np
from jax.experimental import pallas as pl
from jax.experimental.pallas import tpu as pltpu


LANE = 128          # lane width: hidden feature dims are padded to this
SUBLANE = 8         # sublane alignment for slab row offsets / batch tiles


def _round_up(x, m):
    return ((x + m - 1) // m) * m


# ---------------------------------------------------------------------------
# Kernel: fused 3-layer MLP + action-bound affine rescale.
#   obs_ref : (bb, obs_dim) f32
#   p_ref   : (slab_rows, LANE) f32  -- packed parameters (see pack_params)
#   out_ref : (bb, act_dim) f32      -- narrow, only the real action columns
# ---------------------------------------------------------------------------
def make_actor_kernel(obs_dim, act_dim, offsets):
    w1_o, b1_o, w2_o, b2_o, w3_o, b3_o, sc_o, of_o = offsets

    def kernel(obs_ref, p_ref, out_ref):
        x = obs_ref[...]                                   # (bb, obs_dim)

        w1 = p_ref[w1_o:w1_o + obs_dim, :]                 # (obs_dim, 128)
        b1 = p_ref[b1_o:b1_o + 1, :]                       # (1, 128)
        h1 = jnp.dot(x, w1, preferred_element_type=jnp.float32) + b1
        h1 = jnp.maximum(h1, 0.0)                          # (bb, 128)

        w2 = p_ref[w2_o:w2_o + LANE, :]                    # (128, 128), rows >= hidden1 are 0
        b2 = p_ref[b2_o:b2_o + 1, :]
        h2 = jnp.dot(h1, w2, preferred_element_type=jnp.float32) + b2
        h2 = jnp.maximum(h2, 0.0)                          # (bb, 128)

        w3 = p_ref[w3_o:w3_o + LANE, :]                    # (128, 128), rows >= hidden2 are 0
        b3 = p_ref[b3_o:b3_o + 1, :]
        a_raw = jnp.tanh(jnp.dot(h2, w3, preferred_element_type=jnp.float32) + b3)

        scale = p_ref[sc_o:sc_o + 1, :]                    # (1, 128)
        offset = p_ref[of_o:of_o + 1, :]                   # (1, 128)
        act = a_raw * scale + offset                       # (bb, 128) lane-dense compute
        out_ref[...] = act[:, :act_dim]                    # narrow store: real columns only

    return kernel


# ---------------------------------------------------------------------------
# Pack all parameters into one (rows, 128) f32 slab.
#  - weights are (in, out) layout; out dims are lane-padded to 128 with zeros
#  - W2/W3 input dims are padded to 128 rows (zeros) so activations stay
#    lane-dense 128 wide through the matmul chain
#  - each piece starts at a sublane-aligned (multiple of 8) row offset
# ---------------------------------------------------------------------------
def pack_params(w1, b1, w2, b2, w3, b3, scale, offset):
    obs_dim, h1 = w1.shape
    h2 = w2.shape[1]
    act_dim = w3.shape[1]
    assert max(h1, h2, act_dim, obs_dim) <= LANE, "feature dims must be <= 128"

    def lane_pad(a):
        return jnp.pad(a, ((0, 0), (0, LANE - a.shape[1])))

    w1p = lane_pad(w1)                                           # (obs_dim, 128)
    w2p = lane_pad(jnp.pad(w2, ((0, LANE - h1), (0, 0))))        # (128, 128)
    w3p = lane_pad(jnp.pad(w3, ((0, LANE - h2), (0, 0))))        # (128, 128)
    b1p = lane_pad(b1.reshape(1, -1))
    b2p = lane_pad(b2.reshape(1, -1))
    b3p = lane_pad(b3.reshape(1, -1))
    scp = lane_pad(scale.reshape(1, -1))
    ofp = lane_pad(offset.reshape(1, -1))

    pieces = [w1p, b1p, w2p, b2p, w3p, b3p, scp, ofp]
    offsets = []
    rows = 0
    padded = []
    for piece in pieces:
        offsets.append(rows)
        r_pad = _round_up(piece.shape[0], SUBLANE)
        padded.append(jnp.pad(piece, ((0, r_pad - piece.shape[0]), (0, 0))))
        rows += r_pad
    slab = jnp.concatenate(padded, axis=0).astype(jnp.float32)   # (rows, 128)
    return slab, tuple(offsets)


# ---------------------------------------------------------------------------
# Wrapper: batch-tiled pallas_call with a narrow (batch, act_dim) output.
# No obs padding in the hot path: grid = cdiv(batch, bb); Pallas masks the
# partial edge block (rows are independent, so OOB rows never matter).
# ---------------------------------------------------------------------------
def actor_net_forward(obs, slab, offsets, obs_dim, act_dim, block_b=2048):
    batch = obs.shape[0]

    bb = min(block_b, _round_up(batch, SUBLANE))
    # Keep >= 2 grid steps when the batch allows, so v7x's two TensorCores
    # both get work under dimension_semantics=("parallel",).
    if bb >= batch and batch >= 2 * SUBLANE:
        bb = _round_up(pl.cdiv(batch, 2), SUBLANE)

    grid = (pl.cdiv(batch, bb),)
    kernel = make_actor_kernel(obs_dim, act_dim, offsets)

    # VMEM use at bb=2048 is ~3.5 MiB (activations dominate), well below the
    # 32 MiB scoped default on v5e/v6e/v7x; no explicit vmem_limit needed.
    return pl.pallas_call(
        kernel,
        out_shape=jax.ShapeDtypeStruct((batch, act_dim), jnp.float32),
        grid=grid,
        in_specs=[
            pl.BlockSpec((bb, obs_dim), lambda i: (i, 0)),       # batch-tiled obs
            pl.BlockSpec(slab.shape, lambda i: (0, 0)),          # slab: constant block, fetched once
        ],
        out_specs=pl.BlockSpec((bb, act_dim), lambda i: (i, 0)), # narrow output, no wrapper slice
        compiler_params=pltpu.CompilerParams(
            dimension_semantics=("parallel",),                   # megacore / v7x 2-TC sharding
        ),
    )(obs, slab)
    # TODO(synk): if hidden sizes ever grow >= 256, cast obs/slab to bf16 for
    # the three matmuls (keep f32 accumulation + f32 ReLU/tanh) per v6e note.


# ---------------------------------------------------------------------------
# Deterministic parameter init mirroring layer_init():
#   orthogonal weights scaled by `std`, constant-zero bias.
# Weights are returned already transposed to (in, out) for x @ W.
# ---------------------------------------------------------------------------
def orthogonal_init(key, out_dim, in_dim, std):
    rows, cols = out_dim, in_dim
    flat = jax.random.normal(key, (max(rows, cols), min(rows, cols)), jnp.float32)
    q, r = jnp.linalg.qr(flat)
    d = jnp.sign(jnp.diag(r))
    q = q * d[None, :]
    if rows < cols:
        q = q.T
    w = std * q[:rows, :cols]           # (out, in) like torch Linear
    return w.T.astype(jnp.float32)      # transpose to (in, out)


def make_actor_params(key, obs_dim, hidden_sizes, act_dim):
    k1, k2, k3 = jax.random.split(key, 3)
    w1 = orthogonal_init(k1, hidden_sizes[0], obs_dim, std=float(np.sqrt(2)))
    b1 = jnp.zeros((1, hidden_sizes[0]), jnp.float32)
    w2 = orthogonal_init(k2, hidden_sizes[1], hidden_sizes[0], std=float(np.sqrt(2)))
    b2 = jnp.zeros((1, hidden_sizes[1]), jnp.float32)
    w3 = orthogonal_init(k3, act_dim, hidden_sizes[1], std=0.01)
    b3 = jnp.zeros((1, act_dim), jnp.float32)
    return (w1, b1, w2, b2, w3, b3)


if __name__ == "__main__":
    # LunarLanderContinuous-like sizes: obs_dim=8, act_dim=2, hidden (32, 32).
    batch, obs_dim, act_dim = 8, 8, 2
    hidden_sizes = (32, 32)

    key = jax.random.PRNGKey(0)
    k_obs, k_params = jax.random.split(key)

    obs = jax.random.normal(k_obs, (batch, obs_dim), jnp.float32)
    w1, b1, w2, b2, w3, b3 = make_actor_params(k_params, obs_dim, hidden_sizes, act_dim)

    # action_bounds = (low, high); asymmetric to exercise the affine rescale.
    action_low = jnp.array([[-1.0, -2.0]], jnp.float32)
    action_high = jnp.array([[1.0, 2.0]], jnp.float32)
    scale = 0.5 * (action_high - action_low)    # (1, act_dim)
    offset = 0.5 * (action_high + action_low)   # (1, act_dim)
    # (If action_bounds is None in the original module, pass scale=1, offset=0.)

    slab, offsets = pack_params(w1, b1, w2, b2, w3, b3, scale, offset)

    out = actor_net_forward(obs, slab, offsets, obs_dim, act_dim)
    jax.block_until_ready(out)

    # Pure-JAX reference check.
    h1 = jnp.maximum(obs @ w1 + b1, 0.0)
    h2 = jnp.maximum(h1 @ w2 + b2, 0.0)
    ref = jnp.tanh(h2 @ w3 + b3) * scale + offset
    np.testing.assert_allclose(np.asarray(out), np.asarray(ref), rtol=1e-5, atol=1e-5)
    assert out.shape == (batch, act_dim)

    print("KERNEL_OK")
</pallas_src>

<mosaic_0001>
module attributes {stable_mosaic.version = 11 : i64} {
  func.func @kernel(%arg0: i32, %arg1: memref<8x8xf32, #tpu.memory_space<vmem>>, %arg2: memref<304x128xf32, #tpu.memory_space<vmem>>, %arg3: memref<8x2xf32, #tpu.memory_space<vmem>>) attributes {dimension_semantics = [#tpu.dimension_semantics<parallel>], iteration_bounds = array<i64: 1>, scalar_prefetch = 0 : i64, scratch_operands = 0 : i64, tpu.core_type = #tpu.core_type<tc>, window_params = [{transform_indices = @transform_0, window_bounds = array<i64: 8, 8>}, {pipeline_mode = #tpu.pipeline_mode<synchronous>, transform_indices = @transform_1, window_bounds = array<i64: 304, 128>}, {transform_indices = @transform_2, window_bounds = array<i64: 8, 2>}]} {
    %c0 = arith.constant 0 : index
    %c0_0 = arith.constant 0 : index
    %0 = vector.load %arg1[%c0, %c0_0] : memref<8x8xf32, #tpu.memory_space<vmem>>, vector<8x8xf32>
    %c0_1 = arith.constant 0 : index
    %c0_2 = arith.constant 0 : index
    %1 = vector.load %arg2[%c0_1, %c0_2] : memref<304x128xf32, #tpu.memory_space<vmem>>, vector<8x128xf32>
    %c8 = arith.constant 8 : index
    %c0_3 = arith.constant 0 : index
    %2 = vector.load %arg2[%c8, %c0_3] : memref<304x128xf32, #tpu.memory_space<vmem>>, vector<1x128xf32>
    %cst = arith.constant dense<0.000000e+00> : vector<8x128xf32>
    %3 = tpu.matmul %0, %1, %cst {dimension_numbers = #tpu.dot_dimension_numbers<[1], [0], [0], [1], [0, 0, 1, 1], [], []>} : vector<8x8xf32>, vector<8x128xf32>, vector<8x128xf32> -> vector<8x128xf32>
    %4 = vector.broadcast %2 : vector<1x128xf32> to vector<8x128xf32>
    %5 = arith.addf %3, %4 : vector<8x128xf32>
    %cst_4 = arith.constant 0.000000e+00 : f32
    %6 = vector.broadcast %cst_4 : f32 to vector<8x128xf32>
    %7 = arith.maximumf %5, %6 : vector<8x128xf32>
    %c16 = arith.constant 16 : index
    %c0_5 = arith.constant 0 : index
    %8 = vector.load %arg2[%c16, %c0_5] : memref<304x128xf32, #tpu.memory_space<vmem>>, vector<128x128xf32>
    %c144 = arith.constant 144 : index
    %c0_6 = arith.constant 0 : index
    %9 = vector.load %arg2[%c144, %c0_6] : memref<304x128xf32, #tpu.memory_space<vmem>>, vector<1x128xf32>
    %cst_7 = arith.constant dense<0.000000e+00> : vector<8x128xf32>
    %10 = tpu.matmul %7, %8, %cst_7 {dimension_numbers = #tpu.dot_dimension_numbers<[1], [0], [0], [1], [0, 0, 1, 1], [], []>} : vector<8x128xf32>, vector<128x128xf32>, vector<8x128xf32> -> vector<8x128xf32>
    %11 = vector.broadcast %9 : vector<1x128xf32> to vector<8x128xf32>
    %12 = arith.addf %10, %11 : vector<8x128xf32>
    %cst_8 = arith.constant 0.000000e+00 : f32
    %13 = vector.broadcast %cst_8 : f32 to vector<8x128xf32>
    %14 = arith.maximumf %12, %13 : vector<8x128xf32>
    %c152 = arith.constant 152 : index
    %c0_9 = arith.constant 0 : index
    %15 = vector.load %arg2[%c152, %c0_9] : memref<304x128xf32, #tpu.memory_space<vmem>>, vector<128x128xf32>
    %c280 = arith.constant 280 : index
    %c0_10 = arith.constant 0 : index
    %16 = vector.load %arg2[%c280, %c0_10] : memref<304x128xf32, #tpu.memory_space<vmem>>, vector<1x128xf32>
    %cst_11 = arith.constant dense<0.000000e+00> : vector<8x128xf32>
    %17 = tpu.matmul %14, %15, %cst_11 {dimension_numbers = #tpu.dot_dimension_numbers<[1], [0], [0], [1], [0, 0, 1, 1], [], []>} : vector<8x128xf32>, vector<128x128xf32>, vector<8x128xf32> -> vector<8x128xf32>
    %18 = vector.broadcast %16 : vector<1x128xf32> to vector<8x128xf32>
    %19 = arith.addf %17, %18 : vector<8x128xf32>
    %20 = math.tanh %19 : vector<8x128xf32>
    %c288 = arith.constant 288 : index
    %c0_12 = arith.constant 0 : index
    %21 = vector.load %arg2[%c288, %c0_12] : memref<304x128xf32, #tpu.memory_space<vmem>>, vector<1x128xf32>
    %c296 = arith.constant 296 : index
    %c0_13 = arith.constant 0 : index
    %22 = vector.load %arg2[%c296, %c0_13] : memref<304x128xf32, #tpu.memory_space<vmem>>, vector<1x128xf32>
    %23 = vector.broadcast %21 : vector<1x128xf32> to vector<8x128xf32>
    %24 = arith.mulf %20, %23 : vector<8x128xf32>
    %25 = vector.broadcast %22 : vector<1x128xf32> to vector<8x128xf32>
    %26 = arith.addf %24, %25 : vector<8x128xf32>
    %27 = vector.extract_strided_slice %26 {offsets = [0, 0], sizes = [8, 2], strides = [1, 1]} : vector<8x128xf32> to vector<8x2xf32>
    %c0_14 = arith.constant 0 : index
    %c0_15 = arith.constant 0 : index
    %28 = vector.load %arg3[%c0_14, %c0_15] : memref<8x2xf32, #tpu.memory_space<vmem>>, vector<8x2xf32>
    tpu.vector_store %arg3[%c0_14, %c0_15], %27 {strides = array<i32>} : memref<8x2xf32, #tpu.memory_space<vmem>>, vector<8x2xf32>,
    return
  }
  func.func @transform_0(%arg0: i32) -> (i32, i32) {
    %c0_i32 = arith.constant 0 : i32
    %c0_i32_0 = arith.constant 0 : i32
    return %arg0, %c0_i32 : i32, i32
  }
  func.func @transform_1(%arg0: i32) -> (i32, i32) {
    %c0_i32 = arith.constant 0 : i32
    %c0_i32_0 = arith.constant 0 : i32
    %c0_i32_1 = arith.constant 0 : i32
    return %c0_i32, %c0_i32_0 : i32, i32
  }
  func.func @transform_2(%arg0: i32) -> (i32, i32) {
    %c0_i32 = arith.constant 0 : i32
    %c0_i32_0 = arith.constant 0 : i32
    return %arg0, %c0_i32 : i32, i32
  }
}

</mosaic_0001>

<bundles_post_ra>
// kernel: tpu_custom_call.1
= control target key start
LH: loop header
LB: loop body
LE: loop exit
PB: predicated region body
PF: predicated region fallthrough
CT: control target
= control target key end

     0   :  { %7 = vsyncpa [#allocation3], 0  ;;  %s561_s0 = inlined_call_operand.hbm [shape: f32[8,8], index: 0, kind: input, shape index: {}]   ;;  %s562_s1 = inlined_call_operand.hbm [shape: f32[304,128], index: 1, kind: input, shape index: {}]   ;;  %s563_s2 = inlined_call_operand.vmem [shape: f32[8,2], index: 2, kind: output, shape index: {}]  }
   0x1   :  { %8 = vsyncpa [#allocation5], 0  ;;  %s492_s9 = smov [#allocation2]   ;;  %s493_s11 = smov [#allocation4]  }
   0x2   :  { %s15_s10 = sshll.u32 %s492_s9, 4  ;;  %s24_s12 = sshll.u32 %s493_s11, 4  ;;  %s16_s10 = int_to_ptr.vmem [resolvable:$true] %s15_s10  ;;  %s25_s12 = int_to_ptr.vmem [resolvable:$true] %s24_s12 }
   0x3   :  { %s456_s13 = scalar_lea.vmem %s16_s10, 128  ;;  %p461_p1 = scmp.lt.s32.totalorder %s16_s10, %s16_s10 }
   0x4   :  { %p457_p0 = scmp.ne.s32.totalorder %s16_s10, %s456_s13  ;;  %p462_p2 = scmp.lt.s32.totalorder %s456_s13, %s456_s13 }
   0x6   :  { %p463_p3 = por %p462_p2, %p461_p1 }
   0x8   :  { %p464_p4 = pnand %p463_p3, %p457_p0 }
   0xa   :  { %467 = shalt.err (!%p464_p4)
}
   0xb   :  { %18 = dma.hbm_to_vmem [thread:$0]  %s561_s0, 128, %s16_s10, [#allocation3]  }
   0xc   :  { %s476_s16 = scalar_lea.vmem %s25_s12, 4864  ;;  %p481_p6 = scmp.lt.s32.totalorder %s25_s12, %s25_s12 }
   0xd   :  { %p477_p5 = scmp.ne.s32.totalorder %s25_s12, %s476_s16  ;;  %p482_p7 = scmp.lt.s32.totalorder %s476_s16, %s476_s16 }
   0xf   :  { %p483_p8 = por %p482_p7, %p481_p6 }
  0x11   :  { %p484_p9 = pnand %p483_p8, %p477_p5 }
  0x13   :  { %487 = shalt.err (!%p484_p9)
}
  0x14   :  { %s494_s17 = smov 128   ;;  %s495_s18 = smov 8  }
  0x15   :  { %30 = dma.hbm_to_vmem [thread:$0]  %s562_s1, 4864, %s25_s12, [#allocation5], %s494_s17, %s494_s17, %s495_s18  }
  0x16   :  { %488 = dma.done.wait [#allocation3], 128  }
  0x17   :  { %489 = vsyncadd [#allocation3], 4294967168 }
  0x18   :  { %490 = dma.done.wait [#allocation5], 4864  }
  0x19   :  { %491 = vsyncadd [#allocation5], 4294962432  ;;  %v496_v0 = vmov 0.0   ;;  %vm497_vm0 = vmmov 0   ;;  %vm44_vm1 = vcmask 64512   ;;  %v38_v1 = vld [vmem:[#allocation4] sm:$0xff] }
  0x1a   :  { %365 = vmatprep.subr.mxu0 %v496_v0  ;;  %367 = vmatprep.mubr.msk.f32.mxu0 %vm497_vm0, %v496_v0  ;;  %v37_v2 = vld [vmem:[#allocation2] sm:$0xff]  ;;  %v134_v3 = vld [vmem:[#allocation4 + $0x88] sm:$0xff]  ;;  %v133_v4 = vld [vmem:[#allocation4 + $0x80] sm:$0xff]  ;;  %vm315_vm2 = vcmask 15360  }
  0x1b   :  { %370 = vmatprep.subr.mxu1 %v496_v0  ;;  %402 = vmatprep.mubr.msk.f32.mxu1 %vm497_vm0, %v496_v0  ;;  %v132_v5 = vld [vmem:[#allocation4 + $0x78] sm:$0xff]  ;;  %v131_v6 = vld [vmem:[#allocation4 + $0x70] sm:$0xff]  ;;  %v130_v7 = vld [vmem:[#allocation4 + $0x68] sm:$0xff] }
  0x1c   :  { %366 = vmatpush3.msra.mxu0 %v38_v1  ;;  %371 = vmatpush3.msra.mxu1 %v134_v3  ;;  %v129_v8 = vld [vmem:[#allocation4 + $0x60] sm:$0xff]  ;;  %v128_v9 = vld [vmem:[#allocation4 + $0x58] sm:$0xff]  ;;  %v127_v10 = vld [vmem:[#allocation4 + $0x50] sm:$0xff] }
  0x1d   :  { %368 = vmatmul.mubr.msk.f32.vlgmr.msra.gmra.mxu0 %vm44_vm1, %v37_v2  ;;  %372 = vmatprep.subr.mxu1 %v496_v0  ;;  %v126_v11 = vld [vmem:[#allocation4 + $0x48] sm:$0xff]  ;;  %v125_v12 = vld [vmem:[#allocation4 + $0x40] sm:$0xff]  ;;  %v124_v13 = vld [vmem:[#allocation4 + $0x38] sm:$0xff] }
  0x1e   :  { %373 = vmatpush3.msra.mxu1 %v133_v4  ;;  %405 = vmatprep.subr.mxu0 %v496_v0  ;;  %v123_v14 = vld [vmem:[#allocation4 + $0x30] sm:$0xff]  ;;  %v122_v15 = vld [vmem:[#allocation4 + $0x28] sm:$0xff]  ;;  %v121_v16 = vld [vmem:[#allocation4 + $0x20] sm:$0xff] }
  0x1f   :  { %374 = vmatprep.subr.mxu1 %v496_v0  ;;  %437 = vmatprep.mubr.msk.f32.mxu0 %vm497_vm0, %v496_v0  ;;  %v120_v17 = vld [vmem:[#allocation4 + $0x18] sm:$0xff]  ;;  %v119_v18 = vld [vmem:[#allocation4 + $0x10] sm:$0xff]  ;;  %v225_v20 = vld [vmem:[#allocation4 + $0x108] sm:$0xff] }
  0x20   :  { %375 = vmatpush3.msra.mxu1 %v132_v5  ;;  %v226_v19 = vld [vmem:[#allocation4 + $0x110] sm:$0xff]  ;;  %v224_v21 = vld [vmem:[#allocation4 + $0x100] sm:$0xff]  ;;  %v223_v22 = vld [vmem:[#allocation4 + $0xf8] sm:$0xff] }
  0x21   :  { %376 = vmatprep.subr.mxu1 %v496_v0  ;;  %406 = vmatpush3.msra.mxu0 %v226_v19  ;;  %v222_v23 = vld [vmem:[#allocation4 + $0xf0] sm:$0xff]  ;;  %v221_v24 = vld [vmem:[#allocation4 + $0xe8] sm:$0xff]  ;;  %v220_v25 = vld [vmem:[#allocation4 + $0xe0] sm:$0xff] }
  0x22   :  { %377 = vmatpush3.msra.mxu1 %v131_v6  ;;  %407 = vmatprep.subr.mxu0 %v496_v0  ;;  %v219_v26 = vld [vmem:[#allocation4 + $0xd8] sm:$0xff]  ;;  %v218_v27 = vld [vmem:[#allocation4 + $0xd0] sm:$0xff]  ;;  %v217_v28 = vld [vmem:[#allocation4 + $0xc8] sm:$0xff] }
  0x23   :  { %378 = vmatprep.subr.mxu1 %v496_v0  ;;  %408 = vmatpush3.msra.mxu0 %v225_v20  ;;  %v216_v29 = vld [vmem:[#allocation4 + $0xc0] sm:$0xff]  ;;  %v215_v30 = vld [vmem:[#allocation4 + $0xb8] sm:$0xff]  ;;  %v214_v31 = vld [vmem:[#allocation4 + $0xb0] sm:$0xff] }
  0x24   :  { %379 = vmatpush3.msra.mxu1 %v130_v7  ;;  %409 = vmatprep.subr.mxu0 %v496_v0  ;;  %v323_v32 = vld [vmem:[#allocation4 + $0x8] ss:$0 sm:$0xff]  ;;  %v212_v38 = vld [vmem:[#allocation4 + $0xa0] sm:$0xff]  ;;  %v211_v39 = vld [vmem:[#allocation4 + $0x98] sm:$0xff] }
  0x25   :  { %380 = vmatprep.subr.mxu1 %v496_v0  ;;  %410 = vmatpush3.msra.mxu0 %v224_v21  ;;  %v213_v37 = vld [vmem:[#allocation4 + $0xa8] sm:$0xff]  ;;  %v325_v40 = vld [vmem:[#allocation4 + $0x90] ss:$0 sm:$0xff]  ;;  %v326_v45 = vld [vmem:[#allocation4 + $0x118] ss:$0 sm:$0xff] }
  0x26   :  { %381 = vmatpush3.msra.mxu1 %v129_v8  ;;  %411 = vmatprep.subr.mxu0 %v496_v0  ;;  %v327_v49 = vld [vmem:[#allocation4 + $0x120] ss:$0 sm:$0xff]  ;;  %v328_v51 = vld [vmem:[#allocation4 + $0x128] ss:$0 sm:$0xff] }
  0x27   :  { %382 = vmatprep.subr.mxu1 %v496_v0  ;;  %412 = vmatpush3.msra.mxu0 %v223_v22 }
  0x28   :  { %383 = vmatpush3.msra.mxu1 %v128_v9  ;;  %413 = vmatprep.subr.mxu0 %v496_v0 }
  0x29   :  { %384 = vmatprep.subr.mxu1 %v496_v0  ;;  %414 = vmatpush3.msra.mxu0 %v222_v23 }
  0x2a   :  { %385 = vmatpush3.msra.mxu1 %v127_v10  ;;  %415 = vmatprep.subr.mxu0 %v496_v0 }
  0x2b   :  { %386 = vmatprep.subr.mxu1 %v496_v0  ;;  %416 = vmatpush3.msra.mxu0 %v221_v24 }
  0x2c   :  { %387 = vmatpush3.msra.mxu1 %v126_v11  ;;  %417 = vmatprep.subr.mxu0 %v496_v0 }
  0x2d   :  { %388 = vmatprep.subr.mxu1 %v496_v0  ;;  %418 = vmatpush3.msra.mxu0 %v220_v25 }
  0x2e   :  { %389 = vmatpush3.msra.mxu1 %v125_v12  ;;  %419 = vmatprep.subr.mxu0 %v496_v0 }
  0x2f   :  { %390 = vmatprep.subr.mxu1 %v496_v0  ;;  %420 = vmatpush3.msra.mxu0 %v219_v26 }
  0x30   :  { %391 = vmatpush3.msra.mxu1 %v124_v13  ;;  %421 = vmatprep.subr.mxu0 %v496_v0 }
  0x31   :  { %392 = vmatprep.subr.mxu1 %v496_v0  ;;  %422 = vmatpush3.msra.mxu0 %v218_v27 }
  0x32   :  { %393 = vmatpush3.msra.mxu1 %v123_v14  ;;  %423 = vmatprep.subr.mxu0 %v496_v0 }
  0x33   :  { %394 = vmatprep.subr.mxu1 %v496_v0  ;;  %424 = vmatpush3.msra.mxu0 %v217_v28 }
  0x34   :  { %395 = vmatpush3.msra.mxu1 %v122_v15  ;;  %425 = vmatprep.subr.mxu0 %v496_v0 }
  0x35   :  { %396 = vmatprep.subr.mxu1 %v496_v0  ;;  %426 = vmatpush3.msra.mxu0 %v216_v29 }
  0x36   :  { %397 = vmatpush3.msra.mxu1 %v121_v16  ;;  %427 = vmatprep.subr.mxu0 %v496_v0 }
  0x37   :  { %398 = vmatprep.subr.mxu1 %v496_v0  ;;  %428 = vmatpush3.msra.mxu0 %v215_v30 }
  0x38   :  { %399 = vmatpush3.msra.mxu1 %v120_v17  ;;  %429 = vmatprep.subr.mxu0 %v496_v0 }
  0x39   :  { %400 = vmatprep.subr.mxu1 %v496_v0  ;;  %430 = vmatpush3.msra.mxu0 %v214_v31 }
  0x3a   :  { %401 = vmatpush3.msra.mxu1 %v119_v18  ;;  %431 = vmatprep.subr.mxu0 %v496_v0 }
  0x3b   :  { %432 = vmatpush3.msra.mxu0 %v213_v37 }
  0x3c   :  { %433 = vmatprep.subr.mxu0 %v496_v0 }
  0x3d   :  { %434 = vmatpush3.msra.mxu0 %v212_v38 }
  0x3e   :  { %435 = vmatprep.subr.mxu0 %v496_v0 }
  0x3f   :  { %436 = vmatpush3.msra.mxu0 %v211_v39 }
  0xdd   :  { %v114_v33 = vpop.f32.mrf.mxu0 }
  0xde   :  { %v115_v34 = vadd.f32 %v323_v32, %v114_v33 }
  0xdf   :  { %v369_v35 = vpop.f32.mrf.mxu0 }
  0xe0   :  { %v118_v36 = vmax.f32 %v115_v34, 0.0 }
  0xe2   :  { %403 = vmatmul.mubr.f32.vlgmr.msra.gmra.mxu1 %v118_v36 }
 0x1a2   :  { %v206_v41 = vpop.f32.mrf.mxu1 }
 0x1a3   :  { %v207_v42 = vadd.f32 %v325_v40, %v206_v41 }
 0x1a4   :  { %v404_v43 = vpop.f32.mrf.mxu1 }
 0x1a5   :  { %v210_v44 = vmax.f32 %v207_v42, 0.0 }
 0x1a7   :  { %438 = vmatmul.mubr.f32.vlgmr.msra.gmra.mxu0 %v210_v44 }
 0x267   :  { %v298_v46 = vpop.f32.mrf.mxu0 }
 0x268   :  { %v299_v47 = vadd.f32 %v326_v45, %v298_v46 }
 0x269   :  { %v439_v48 = vpop.f32.mrf.mxu0 }
 0x26a   :  { %446 = vtanh.f32 %v299_v47 }
 0x277   :  { %v447_v50 = vpop.eup %446 }
 0x278   :  { %v309_v52 = vmul.f32 %v447_v50, %v327_v49 }
 0x27a   :  { %v314_v53 = vadd.f32 %v328_v51, %v309_v52 }
 0x27c   :  { %316 = vst.msk [vmem:[%s563_s2] sm:$0xff] %vm315_vm2, %v314_v53 }
 0x27d   :  { %321 = vsyncpa [#allocation3], 1 }
 0x27e   :  { %322 = vsyncpa [#allocation5], 1 }

</bundles_post_ra>
